<compile_context>
chip_gen: v5e
topology: v5e:2x2
jax: 0.10.0
libtpu: 0.0.40
codegen_flags: <defaults>
</compile_context>

<pallas_src>
import jax
import jax.numpy as jnp
from jax.experimental import pallas as pl
from jax.experimental.pallas import tpu as pltpu


def final_layer_kernel(x_ref, c_ref, w_shift_ref, w_scale_ref, w_lin_ref,
                       b_shift_ref, b_scale_ref, b_lin_ref, o_ref):
    mxu_dtype = w_shift_ref.dtype  # bf16 feeds, f32 accumulate

    # ---- modulation: SiLU(c) @ [W_shift | W_scale] + bias (scale bias has +1 folded) ----
    c = c_ref[...].astype(jnp.float32)
    silu_c = (c * jax.nn.sigmoid(c)).astype(mxu_dtype)
    shift = jnp.dot(silu_c, w_shift_ref[...],
                    preferred_element_type=jnp.float32) + b_shift_ref[...]
    scale1 = jnp.dot(silu_c, w_scale_ref[...],
                     preferred_element_type=jnp.float32) + b_scale_ref[...]

    # ---- LayerNorm(x), eps=1e-6, no affine (single-pass stats, f32) ----
    x = x_ref[...].astype(jnp.float32)
    mean = jnp.mean(x, axis=-1, keepdims=True)
    meansq = jnp.mean(x * x, axis=-1, keepdims=True)
    var = jnp.maximum(meansq - mean * mean, 0.0)
    xn = (x - mean) * jax.lax.rsqrt(var + 1e-6)

    # ---- modulate + final projection (lane-dense padded output) ----
    y = (xn * scale1 + shift).astype(mxu_dtype)
    out = jnp.dot(y, w_lin_ref[...],
                  preferred_element_type=jnp.float32) + b_lin_ref[...]
    o_ref[...] = out.astype(o_ref.dtype)


def final_layer(x, c, w_mod, b_mod, w_lin, b_lin, *,
                block_rows=512, mxu_dtype=jnp.bfloat16):
    """x: (B, D), c: (B, D). w_mod: (D, 2D), b_mod: (2D,), w_lin: (D, O), b_lin: (O,).
    Weights are pre-transposed (in, out) so the kernel does plain row-major matmuls."""
    B, D = x.shape
    O = w_lin.shape[1]

    # Split modulation weights into shift/scale halves (avoids an unaligned
    # lane slice of the (B, 2D) matmul result in the kernel) and fold the "+1"
    # into the scale bias.
    w_shift = w_mod[:, :D].astype(mxu_dtype)
    w_scale = w_mod[:, D:].astype(mxu_dtype)
    b_shift = b_mod[:D].reshape(1, D).astype(jnp.float32)
    b_scale = (b_mod[D:] + 1.0).reshape(1, D).astype(jnp.float32)

    # Pad output channels to a lane-dense multiple of 128; slice back after.
    OP = max(128, pl.cdiv(O, 128) * 128)
    w_lin_p = jnp.zeros((D, OP), mxu_dtype).at[:, :O].set(w_lin.astype(mxu_dtype))
    b_lin_p = jnp.zeros((1, OP), jnp.float32).at[:, :O].set(b_lin.astype(jnp.float32))

    # Batch tiling: one block if small, else block_rows-row tiles (pipelined).
    if B <= block_rows:
        TB, B_pad = B, B
    else:
        TB = block_rows
        B_pad = pl.cdiv(B, TB) * TB
    if B_pad != B:
        pad = ((0, B_pad - B), (0, 0))
        x = jnp.pad(x, pad)
        c = jnp.pad(c, pad)

    out = pl.pallas_call(
        final_layer_kernel,
        out_shape=jax.ShapeDtypeStruct((B_pad, OP), x.dtype),
        grid=(B_pad // TB,),
        in_specs=[
            pl.BlockSpec((TB, D), lambda i: (i, 0)),   # x tile
            pl.BlockSpec((TB, D), lambda i: (i, 0)),   # c tile
            pl.BlockSpec((D, D), lambda i: (0, 0)),    # w_shift (resident)
            pl.BlockSpec((D, D), lambda i: (0, 0)),    # w_scale (resident)
            pl.BlockSpec((D, OP), lambda i: (0, 0)),   # w_lin padded (resident)
            pl.BlockSpec((1, D), lambda i: (0, 0)),    # b_shift
            pl.BlockSpec((1, D), lambda i: (0, 0)),    # b_scale (+1 folded)
            pl.BlockSpec((1, OP), lambda i: (0, 0)),   # b_lin padded
        ],
        out_specs=pl.BlockSpec((TB, OP), lambda i: (i, 0)),
        compiler_params=pltpu.CompilerParams(
            dimension_semantics=("parallel",)),
    )(x, c, w_shift, w_scale, w_lin_p, b_shift, b_scale, b_lin_p)

    return out[:B, :O]


def reference_f32(x, c, w_mod, b_mod, w_lin, b_lin):
    """Pure-f32 JAX reference matching the PyTorch forward."""
    silu_c = c * jax.nn.sigmoid(c)
    mod = silu_c @ w_mod + b_mod
    D = x.shape[-1]
    shift, scale = mod[:, :D], mod[:, D:]
    mean = jnp.mean(x, axis=-1, keepdims=True)
    var = jnp.mean((x - mean) ** 2, axis=-1, keepdims=True)
    xn = (x - mean) / jnp.sqrt(var + 1e-6)
    y = xn * (scale + 1.0) + shift
    return y @ w_lin + b_lin


def reference_mxu(x, c, w_mod, b_mod, w_lin, b_lin, mxu_dtype=jnp.bfloat16):
    """Reference with the same bf16-MXU / f32-accumulate precision as the kernel."""
    silu_c = (c * jax.nn.sigmoid(c)).astype(mxu_dtype)
    mod = jnp.dot(silu_c, w_mod.astype(mxu_dtype),
                  preferred_element_type=jnp.float32) + b_mod
    D = x.shape[-1]
    shift, scale = mod[:, :D], mod[:, D:]
    mean = jnp.mean(x, axis=-1, keepdims=True)
    var = jnp.mean((x - mean) ** 2, axis=-1, keepdims=True)
    xn = (x - mean) / jnp.sqrt(var + 1e-6)
    y = (xn * (scale + 1.0) + shift).astype(mxu_dtype)
    return jnp.dot(y, w_lin.astype(mxu_dtype),
                   preferred_element_type=jnp.float32) + b_lin


if __name__ == "__main__":
    B = 16              # batch/tokens (small; > block_rows below to exercise tiling)
    D = 32              # model_channels
    O = 8               # out_channels

    key = jax.random.PRNGKey(0)
    k_x, k_c, k_wm, k_bm, k_wl, k_bl = jax.random.split(key, 6)

    x = jax.random.normal(k_x, (B, D), dtype=jnp.float32)
    c = jax.random.normal(k_c, (B, D), dtype=jnp.float32)

    # Deterministic "PyTorch-like" init (uniform +/- 1/sqrt(fan_in)); stored
    # pre-transposed as (in, out) so the kernel does x @ W.
    lim = 1.0 / (D ** 0.5)
    w_mod = jax.random.uniform(k_wm, (D, 2 * D), jnp.float32, -lim, lim)
    b_mod = jax.random.uniform(k_bm, (2 * D,), jnp.float32, -lim, lim)
    w_lin = jax.random.uniform(k_wl, (D, O), jnp.float32, -lim, lim)
    b_lin = jax.random.uniform(k_bl, (O,), jnp.float32, -lim, lim)

    # block_rows=8 so the small demo still exercises a multi-step pipelined grid.
    out = final_layer(x, c, w_mod, b_mod, w_lin, b_lin, block_rows=8)
    out = jax.block_until_ready(out)
    assert out.shape == (B, O), out.shape

    # Tight check vs a matched-precision (bf16 MXU / f32 acc) reference.
    ref_m = reference_mxu(x, c, w_mod, b_mod, w_lin, b_lin)
    assert jnp.allclose(out, ref_m, atol=1e-3, rtol=1e-3), \
        f"max abs err vs matched ref {jnp.max(jnp.abs(out - ref_m))}"

    # Loose check vs the pure-f32 PyTorch-semantics reference (bf16 rounding).
    ref_f = reference_f32(x, c, w_mod, b_mod, w_lin, b_lin)
    assert jnp.allclose(out, ref_f, atol=5e-2, rtol=5e-2), \
        f"max abs err vs f32 ref {jnp.max(jnp.abs(out - ref_f))}"

    print("KERNEL_OK")
</pallas_src>

<mosaic_0001>
module attributes {stable_mosaic.version = 11 : i64} {
  func.func @final_layer_kernel(%arg0: i32, %arg1: memref<8x32xf32, #tpu.memory_space<vmem>>, %arg2: memref<8x32xf32, #tpu.memory_space<vmem>>, %arg3: memref<32x32xbf16, #tpu.memory_space<vmem>>, %arg4: memref<32x32xbf16, #tpu.memory_space<vmem>>, %arg5: memref<32x128xbf16, #tpu.memory_space<vmem>>, %arg6: memref<1x32xf32, #tpu.memory_space<vmem>>, %arg7: memref<1x32xf32, #tpu.memory_space<vmem>>, %arg8: memref<1x128xf32, #tpu.memory_space<vmem>>, %arg9: memref<8x128xf32, #tpu.memory_space<vmem>>) attributes {dimension_semantics = [#tpu.dimension_semantics<parallel>], iteration_bounds = array<i64: 2>, scalar_prefetch = 0 : i64, scratch_operands = 0 : i64, tpu.core_type = #tpu.core_type<tc>, window_params = [{transform_indices = @transform_0, window_bounds = array<i64: 8, 32>}, {transform_indices = @transform_1, window_bounds = array<i64: 8, 32>}, {pipeline_mode = #tpu.pipeline_mode<synchronous>, transform_indices = @transform_2, window_bounds = array<i64: 32, 32>}, {pipeline_mode = #tpu.pipeline_mode<synchronous>, transform_indices = @transform_3, window_bounds = array<i64: 32, 32>}, {pipeline_mode = #tpu.pipeline_mode<synchronous>, transform_indices = @transform_4, window_bounds = array<i64: 32, 128>}, {pipeline_mode = #tpu.pipeline_mode<synchronous>, transform_indices = @transform_5, window_bounds = array<i64: 1, 32>}, {pipeline_mode = #tpu.pipeline_mode<synchronous>, transform_indices = @transform_6, window_bounds = array<i64: 1, 32>}, {pipeline_mode = #tpu.pipeline_mode<synchronous>, transform_indices = @transform_7, window_bounds = array<i64: 1, 128>}, {transform_indices = @transform_8, window_bounds = array<i64: 8, 128>}]} {
    %c0 = arith.constant 0 : index
    %c0_0 = arith.constant 0 : index
    %0 = vector.load %arg2[%c0, %c0_0] : memref<8x32xf32, #tpu.memory_space<vmem>>, vector<8x32xf32>
    %1 = arith.negf %0 : vector<8x32xf32>
    %2 = math.exp %1 : vector<8x32xf32>
    %cst = arith.constant 1.000000e+00 : f32
    %3 = vector.broadcast %cst : f32 to vector<8x32xf32>
    %4 = arith.addf %3, %2 : vector<8x32xf32>
    %5 = arith.divf %3, %4 : vector<8x32xf32>
    %6 = arith.mulf %0, %5 : vector<8x32xf32>
    %7 = arith.truncf %6 : vector<8x32xf32> to vector<8x32xbf16>
    %c0_1 = arith.constant 0 : index
    %c0_2 = arith.constant 0 : index
    %8 = vector.load %arg3[%c0_1, %c0_2] : memref<32x32xbf16, #tpu.memory_space<vmem>>, vector<32x32xbf16>
    %cst_3 = arith.constant dense<0.000000e+00> : vector<8x32xf32>
    %9 = tpu.matmul %7, %8, %cst_3 {dimension_numbers = #tpu.dot_dimension_numbers<[1], [0], [0], [1], [0, 0, 1, 1], [], []>} : vector<8x32xbf16>, vector<32x32xbf16>, vector<8x32xf32> -> vector<8x32xf32>
    %c0_4 = arith.constant 0 : index
    %c0_5 = arith.constant 0 : index
    %10 = vector.load %arg6[%c0_4, %c0_5] : memref<1x32xf32, #tpu.memory_space<vmem>>, vector<1x32xf32>
    %11 = vector.broadcast %10 : vector<1x32xf32> to vector<8x32xf32>
    %12 = arith.addf %9, %11 : vector<8x32xf32>
    %c0_6 = arith.constant 0 : index
    %c0_7 = arith.constant 0 : index
    %13 = vector.load %arg4[%c0_6, %c0_7] : memref<32x32xbf16, #tpu.memory_space<vmem>>, vector<32x32xbf16>
    %cst_8 = arith.constant dense<0.000000e+00> : vector<8x32xf32>
    %14 = tpu.matmul %7, %13, %cst_8 {dimension_numbers = #tpu.dot_dimension_numbers<[1], [0], [0], [1], [0, 0, 1, 1], [], []>} : vector<8x32xbf16>, vector<32x32xbf16>, vector<8x32xf32> -> vector<8x32xf32>
    %c0_9 = arith.constant 0 : index
    %c0_10 = arith.constant 0 : index
    %15 = vector.load %arg7[%c0_9, %c0_10] : memref<1x32xf32, #tpu.memory_space<vmem>>, vector<1x32xf32>
    %16 = vector.broadcast %15 : vector<1x32xf32> to vector<8x32xf32>
    %17 = arith.addf %14, %16 : vector<8x32xf32>
    %c0_11 = arith.constant 0 : index
    %c0_12 = arith.constant 0 : index
    %18 = vector.load %arg1[%c0_11, %c0_12] : memref<8x32xf32, #tpu.memory_space<vmem>>, vector<8x32xf32>
    %cst_13 = arith.constant dense<0.000000e+00> : vector<8xf32>
    %19 = vector.multi_reduction <add>, %18, %cst_13 [1] : vector<8x32xf32> to vector<8xf32>
    %20 = vector.shape_cast %19 : vector<8xf32> to vector<8x1xf32>
    %cst_14 = arith.constant 3.200000e+01 : f32
    %21 = vector.broadcast %cst_14 : f32 to vector<8x1xf32>
    %22 = arith.divf %20, %21 : vector<8x1xf32>
    %23 = arith.mulf %18, %18 : vector<8x32xf32>
    %cst_15 = arith.constant dense<0.000000e+00> : vector<8xf32>
    %24 = vector.multi_reduction <add>, %23, %cst_15 [1] : vector<8x32xf32> to vector<8xf32>
    %25 = vector.shape_cast %24 : vector<8xf32> to vector<8x1xf32>
    %cst_16 = arith.constant 3.200000e+01 : f32
    %26 = vector.broadcast %cst_16 : f32 to vector<8x1xf32>
    %27 = arith.divf %25, %26 : vector<8x1xf32>
    %28 = arith.mulf %22, %22 : vector<8x1xf32>
    %29 = arith.subf %27, %28 : vector<8x1xf32>
    %cst_17 = arith.constant 0.000000e+00 : f32
    %30 = vector.broadcast %cst_17 : f32 to vector<8x1xf32>
    %31 = arith.maximumf %29, %30 : vector<8x1xf32>
    %32 = vector.broadcast %22 : vector<8x1xf32> to vector<8x32xf32>
    %33 = arith.subf %18, %32 : vector<8x32xf32>
    %cst_18 = arith.constant 9.99999997E-7 : f32
    %34 = vector.broadcast %cst_18 : f32 to vector<8x1xf32>
    %35 = arith.addf %31, %34 : vector<8x1xf32>
    %36 = math.rsqrt %35 : vector<8x1xf32>
    %37 = vector.broadcast %36 : vector<8x1xf32> to vector<8x32xf32>
    %38 = arith.mulf %33, %37 : vector<8x32xf32>
    %39 = arith.mulf %38, %17 : vector<8x32xf32>
    %40 = arith.addf %39, %12 : vector<8x32xf32>
    %41 = arith.truncf %40 : vector<8x32xf32> to vector<8x32xbf16>
    %c0_19 = arith.constant 0 : index
    %c0_20 = arith.constant 0 : index
    %42 = vector.load %arg5[%c0_19, %c0_20] : memref<32x128xbf16, #tpu.memory_space<vmem>>, vector<32x128xbf16>
    %cst_21 = arith.constant dense<0.000000e+00> : vector<8x128xf32>
    %43 = tpu.matmul %41, %42, %cst_21 {dimension_numbers = #tpu.dot_dimension_numbers<[1], [0], [0], [1], [0, 0, 1, 1], [], []>} : vector<8x32xbf16>, vector<32x128xbf16>, vector<8x128xf32> -> vector<8x128xf32>
    %c0_22 = arith.constant 0 : index
    %c0_23 = arith.constant 0 : index
    %44 = vector.load %arg8[%c0_22, %c0_23] : memref<1x128xf32, #tpu.memory_space<vmem>>, vector<1x128xf32>
    %45 = vector.broadcast %44 : vector<1x128xf32> to vector<8x128xf32>
    %46 = arith.addf %43, %45 : vector<8x128xf32>
    %c0_24 = arith.constant 0 : index
    %c0_25 = arith.constant 0 : index
    %47 = vector.load %arg9[%c0_24, %c0_25] : memref<8x128xf32, #tpu.memory_space<vmem>>, vector<8x128xf32>
    tpu.vector_store %arg9[%c0_24, %c0_25], %46 {strides = array<i32>} : memref<8x128xf32, #tpu.memory_space<vmem>>, vector<8x128xf32>,
    return
  }
  func.func @transform_0(%arg0: i32) -> (i32, i32) {
    %c0_i32 = arith.constant 0 : i32
    %c0_i32_0 = arith.constant 0 : i32
    return %arg0, %c0_i32 : i32, i32
  }
  func.func @transform_1(%arg0: i32) -> (i32, i32) {
    %c0_i32 = arith.constant 0 : i32
    %c0_i32_0 = arith.constant 0 : i32
    return %arg0, %c0_i32 : i32, i32
  }
  func.func @transform_2(%arg0: i32) -> (i32, i32) {
    %c0_i32 = arith.constant 0 : i32
    %c0_i32_0 = arith.constant 0 : i32
    %c0_i32_1 = arith.constant 0 : i32
    return %c0_i32, %c0_i32_0 : i32, i32
  }
  func.func @transform_3(%arg0: i32) -> (i32, i32) {
    %c0_i32 = arith.constant 0 : i32
    %c0_i32_0 = arith.constant 0 : i32
    %c0_i32_1 = arith.constant 0 : i32
    return %c0_i32, %c0_i32_0 : i32, i32
  }
  func.func @transform_4(%arg0: i32) -> (i32, i32) {
    %c0_i32 = arith.constant 0 : i32
    %c0_i32_0 = arith.constant 0 : i32
    %c0_i32_1 = arith.constant 0 : i32
    return %c0_i32, %c0_i32_0 : i32, i32
  }
  func.func @transform_5(%arg0: i32) -> (i32, i32) {
    %c0_i32 = arith.constant 0 : i32
    %c0_i32_0 = arith.constant 0 : i32
    %c0_i32_1 = arith.constant 0 : i32
    return %c0_i32, %c0_i32_0 : i32, i32
  }
  func.func @transform_6(%arg0: i32) -> (i32, i32) {
    %c0_i32 = arith.constant 0 : i32
    %c0_i32_0 = arith.constant 0 : i32
    %c0_i32_1 = arith.constant 0 : i32
    return %c0_i32, %c0_i32_0 : i32, i32
  }
  func.func @transform_7(%arg0: i32) -> (i32, i32) {
    %c0_i32 = arith.constant 0 : i32
    %c0_i32_0 = arith.constant 0 : i32
    %c0_i32_1 = arith.constant 0 : i32
    return %c0_i32, %c0_i32_0 : i32, i32
  }
  func.func @transform_8(%arg0: i32) -> (i32, i32) {
    %c0_i32 = arith.constant 0 : i32
    %c0_i32_0 = arith.constant 0 : i32
    return %arg0, %c0_i32 : i32, i32
  }
}

</mosaic_0001>

<bundles_post_ra>
// kernel: tpu_custom_call.1
= control target key start
LH: loop header
LB: loop body
LE: loop exit
PB: predicated region body
PF: predicated region fallthrough
CT: control target
= control target key end

     0   :  { %s1356_s0 = inlined_call_operand.hbm [shape: f32[16,32], index: 0, kind: input, shape index: {}]   ;;  %s1357_s1 = inlined_call_operand.hbm [shape: f32[16,32], index: 1, kind: input, shape index: {}]   ;;  %s1358_s2 = inlined_call_operand.hbm [shape: bf16[32,32], index: 2, kind: input, shape index: {}]   ;;  %s1359_s3 = inlined_call_operand.hbm [shape: bf16[32,32], index: 3, kind: input, shape index: {}]   ;;  %s1360_s4 = inlined_call_operand.hbm [shape: bf16[32,128], index: 4, kind: input, shape index: {}]   ;;  %s1361_s5 = inlined_call_operand.vmem [shape: f32[1,32], index: 5, kind: input, shape index: {}]   ;;  %s1362_s6 = inlined_call_operand.vmem [shape: f32[1,32], index: 6, kind: input, shape index: {}]   ;;  %s1363_s7 = inlined_call_operand.vmem [shape: f32[1,128], index: 7, kind: input, shape index: {}]   ;;  %s1364_s8 = inlined_call_operand.hbm [shape: f32[16,128], index: 8, kind: output, shape index: {}]  }
   0x1   :  { %1369 = sst [smem:[#allocation21_spill]] %s1358_s2 }
   0x2   :  { %1370 = sst [smem:[#allocation22_spill]] %s1359_s3 }
   0x3   :  { %1371 = sst [smem:[#allocation23_spill]] %s1360_s4 }
   0x4   :  { %13 = vsyncpa [#allocation3], 0 }
   0x5   :  { %15 = vsyncpa [#allocation3 + $0x1], 0 }
   0x6   :  { %16 = vsyncpa [#allocation6], 0 }
   0x7   :  { %18 = vsyncpa [#allocation6 + $0x1], 0 }
   0x8   :  { %19 = vsyncpa [#allocation9], 0 }
   0x9   :  { %20 = vsyncpa [#allocation4], 0 }
   0xa   :  { %22 = vsyncpa [#allocation4 + $0x1], 0  ;;  %s1146_s27 = smov 0   ;;  %s1148_s28 = smov 0  }
   0xb   :  { %s1150_s29 = smov 0   ;;  %s1152_s30 = smov 0  }
   0xc LB: > { %1372 = sst [smem:[#allocation17_spill]] %s1089_s29  ;;  %s1170_s12 = sadd.s32 4294967295, %s1093_s30   ;;  %s1093_s30 = sphi %s1152_s30, %s1388_s30   ;;  %s1089_s29 = sphi %s1150_s29, %s1390_s29   ;;  %s1085_s28 = sphi %s1148_s28, %s1392_s28   ;;  %s1081_s27 = sphi %s1146_s27, %s1391_s27  }
   0xd   : > { %1373 = sst [smem:[#allocation18_spill]] %s1093_s30  ;;  %p715_p0 = scmp.ge.s32.totalorder %s1093_s30, 1 }
   0xe   : > { %s1374_s2 = sld [smem:[#allocation21_spill]]  ;;  %p49_p1 = scmp.eq.s32.totalorder %s1170_s12, 0 }
   0xf   : > { %p237_p2 = scmp.lt.s32.totalorder %s1093_s30, 3  ;;  %s1095_s14 = smov [#allocation7]  }
  0x10   : > { %s250_s15 = sshll.u32 %s1095_s14, 4  ;;  %s1376_s3 = sld [smem:[#allocation22_spill]]  ;;  %s251_s15 = int_to_ptr.vmem [resolvable:$true] %s250_s15 }
  0x11   : > { %p1175_p3 = pnand %p715_p0, %p237_p2  ;;  %s1378_s4 = sld [smem:[#allocation23_spill]] }
  0x12   : > { %s1096_s23 = smov [#allocation8]   ;;  %s1097_s25 = smov 64  }
  0x13   : > { %p787_p4 = pneg %p1175_p3  ;;  %s264_s24 = sshll.u32 %s1096_s23, 4  ;;  %s265_s24 = int_to_ptr.vmem [resolvable:$true] %s264_s24 }
  0x14   : > { %s248_s11 = sshll.u32 %s1374_s2, 4  ;;  %s1098_s26 = smov 4   ;;  %s249_s11 = int_to_ptr.hbm [resolvable:$true] %s248_s11 }
  0x15   : > { %p1187_p6 = pnand %p787_p4, %p49_p1  ;;  %s1099_s9 = smov [#allocation10]  }
  0x16   : > { %s262_s18 = sshll.u32 %s1376_s3, 4  ;;  %s278_s10 = sshll.u32 %s1099_s9, 4  ;;  %s263_s18 = int_to_ptr.hbm [resolvable:$true] %s262_s18  ;;  %s279_s10 = int_to_ptr.vmem [resolvable:$true] %s278_s10 }
  0x17   : > { %s276_s22 = sshll.u32 %s1378_s4, 4  ;;  %s714_s14 = sadd.s32 4294967294, %s1093_s30   ;;  %s277_s22 = int_to_ptr.hbm [resolvable:$true] %s276_s22 }
  0x18   : > { %790 = dma.hbm_to_vmem [thread:$0]  (!%p1187_p6), %s249_s11, 256, %s251_s15, [#allocation6], %s1097_s25, %s1097_s25, %s1098_s26  }
  0x19   : > { %793 = dma.hbm_to_vmem [thread:$0]  (!%p1187_p6), %s263_s18, 256, %s265_s24, [#allocation9], %s1097_s25, %s1097_s25, %s1098_s26  }
  0x1a   : > { %796 = dma.hbm_to_vmem [thread:$0]  (!%p1187_p6), %s277_s22, 256, %s279_s10, [#allocation9], %s1097_s25, %s1097_s25, %s1098_s26  }
  0x1b   : > { %s1202_s16 = sadd.s32 1, %s1093_s30   ;;  %s35_s17 = sadd.s32 1, %s1089_s29 }
  0x1c   : > { %1379 = sst [smem:[#allocation19_spill]] %s1202_s16  ;;  %s32_s11 = ssub.s32 %s1093_s30, %s1202_s16 }
  0x1d   : > { %p42_p7 = scmp.ne.s32.totalorder %s1089_s29, %s1085_s28  ;;  %p33_p8 = scmp.eq.s32.totalorder %s32_s11, 0 }
  0x1e   : > { %p43_p9 = scmp.eq.s32.totalorder %s1093_s30, 0  ;;  %p48_p10 = scmp.ne.s32.totalorder %s1085_s28, %s1081_s27 }
  0x1f   : > { %p224_p11 = scmp.eq.s32.totalorder %s1170_s12, 1  ;;  %p230_p2 = scmp.eq.s32.totalorder %s714_s14, 1 }
  0x20   : > { %s1214_s15 = scalar_select %p33_p8, %s1089_s29, %s35_s17  }
  0x21   : > { %p1216_p12 = por %p43_p9, %p42_p7  ;;  %p1222_p13 = por %p49_p1, %p48_p10 }
  0x22   : > { %1380 = sst [smem:[#allocation20_spill]] %s1214_s15  ;;  %p1226_p0 = por %p224_p11, %p42_p7 }
  0x23   : > { %p811_p4 = scmp.lt.s32.totalorder %s1093_s30, 2  ;;  %s301_s21 = sand.u32 1, %s1089_s29  }
  0x24   : > { %p1232_p6 = por %p230_p2, %p48_p10  ;;  %s720_s23 = sshll.u32 %s301_s21, 3 }
  0x25   : > { %s721_s24 = sshll.u32 %s1093_s30, 3  ;;  %s305_s17 = scalar_lea.vmem [#allocation2], %s720_s23 }
  0x26   : > { %s309_s9 = scalar_lea.hbm %s1356_s0, %s721_s24  ;;  %s313_s11 = sshll.u32 %s305_s17, 4  ;;  %s314_s11 = int_to_ptr.vmem [resolvable:$true] %s313_s11 }
  0x27   : > { %s311_s10 = sshll.u32 %s309_s9, 4  ;;  %p1242_p7 = pnand %p811_p4, %p1216_p12  ;;  %s312_s10 = int_to_ptr.hbm [resolvable:$true] %s311_s10 }
  0x28   : > { %s328_s4 = scalar_lea.hbm %s1357_s1, %s721_s24  ;;  %s320_s15 = sand.u32 1, %s1093_s30  }
  0x29   : > { %s302_s29 = scalar_lea.sflag [#allocation3], %s301_s21  ;;  %s955_s25 = sshra.s32 %s312_s10, 4  ;;  %s956_s25 = int_to_ptr.hbm [resolvable:$true] %s955_s25 }
  0x2a   : > { %s957_s26 = scalar_lea.hbm %s956_s25, 8  ;;  %p959_p9 = pneg %p1242_p7 }
  0x2b   : > { %p958_p8 = scmp.ne.s32.totalorder %s956_s25, %s957_s26  ;;  %s962_s17 = scalar_lea.hbm %s1356_s0, 16 }
  0x2c   : > { %p963_p12 = scmp.lt.s32.totalorder %s956_s25, %s1356_s0  ;;  %p964_p2 = scmp.lt.s32.totalorder %s962_s17, %s957_s26 }
  0x2d   : > { %p960_p10 = pnand %p959_p9, %p958_p8 }
  0x2e   : > { %p965_p4 = por %p964_p2, %p963_p12 }
  0x2f   : > { %p961_p11 = pneg %p960_p10 }
  0x31   : > { %p966_p5 = pnand %p965_p4, %p961_p11 }
  0x33   : > { %969 = shalt.err (!%p966_p5)
}
  0x34   : > { %800 = dma.hbm_to_vmem [thread:$0]  (!%p1242_p7), %s312_s10, 128, %s314_s11, %s302_s29  }
  0x35   : > { %s330_s21 = sshll.u32 %s328_s4, 4  ;;  %s324_s24 = scalar_lea.vmem [#allocation5], %s720_s23  ;;  %s331_s21 = int_to_ptr.hbm [resolvable:$true] %s330_s21 }
  0x36   : > { %s332_s16 = sshll.u32 %s324_s24, 4  ;;  %s321_s30 = scalar_lea.sflag [#allocation6], %s320_s15  ;;  %s333_s16 = int_to_ptr.vmem [resolvable:$true] %s332_s16 }
  0x37   : > { %s985_s18 = sshra.s32 %s331_s21, 4  ;;  %s992_s17 = scalar_lea.hbm %s1357_s1, 16  ;;  %s986_s18 = int_to_ptr.hbm [resolvable:$true] %s985_s18 }
  0x38   : > { %s987_s9 = scalar_lea.hbm %s986_s18, 8  ;;  %p993_p5 = scmp.lt.s32.totalorder %s986_s18, %s1357_s1 }
  0x39   : > { %p988_p8 = scmp.ne.s32.totalorder %s986_s18, %s987_s9  ;;  %p994_p11 = scmp.lt.s32.totalorder %s992_s17, %s987_s9 }
  0x3b   : > { %p990_p10 = pnand %p988_p8, %p959_p9  ;;  %p995_p2 = por %p994_p11, %p993_p5 }
  0x3d   : > { %p991_p12 = pneg %p990_p10 }
  0x3f   : > { %p996_p4 = pnand %p995_p2, %p991_p12 }
  0x41   : > { %999 = shalt.err (!%p996_p4)
}
  0x42   : > { %803 = dma.hbm_to_vmem [thread:$0]  (!%p1242_p7), %s331_s21, 128, %s333_s16, %s321_s30  }
  0x43   : > { %341 = sbr.rel (%p1175_p3) target bundleno = 388 (0x184), region = 52  ;;  %s1277_s4 = sand.u32 (!%p1175_p3), 1, %s1085_s28  }
  0x44   : > { %s1280_s15 = sshll.u32 (!%p1175_p3), %s1277_s4, 3  ;;  %s344_s23 = scalar_lea.sflag (!%p1175_p3), [#allocation3], %s1277_s4 }
  0x45   : > { %s347_s10 = scalar_lea.vmem (!%p1175_p3), [#allocation2], %s1280_s15 }
  0x48   : > { %1060 = dma.done.wait (%p1222_p13), %s344_s23, 128  }
  0x49   : > { %1062 = vsyncadd (%p1222_p13), %s344_s23, 4294967168  ;;  %s353_s30 = sand.u32 1, %s1170_s12   ;;  %s357_s16 = scalar_lea.vmem [#allocation5], %s1280_s15 }
  0x4a   : > { %s354_s13 = scalar_lea.sflag [#allocation6], %s353_s30 }
  0x4b   : > { %1064 = dma.done.wait (%p1222_p13), %s354_s13, 128  }
  0x4c   : > { %1066 = vsyncadd (%p1222_p13), %s354_s13, 4294967168 }
  0x4d   : > { %1068 = dma.done.wait (%p49_p1), [#allocation6], 256  }
  0x4e   : > { %1070 = vsyncadd (%p49_p1), [#allocation6], 4294967040 }
  0x4f   : > { %1072 = dma.done.wait (%p49_p1), [#allocation9], 512  }
  0x50   : > { %1074 = vsyncadd (%p49_p1), [#allocation9], 4294966784  ;;  %vm454_vm0 = vcmask 261120   ;;  %v1302_v0 = vld [vmem:[%s347_s10] sm:$0xff]  ;;  %v766_v2 = vld [vmem:[#allocation8 + $0x8] sm:$0xff]  ;;  %v1100_v24 = vmov 32.0  }
  0x51   : > { %v764_v1 = vld [vmem:[#allocation7 + $0x8] sm:$0xff]  ;;  %v505_v3 = vsel %vm454_vm0, %v1302_v0, 0.0  ;;  %v412_v4 = vld [vmem:[%s357_s16] sm:$0xff]  ;;  %v763_v5 = vld [vmem:[#allocation7] sm:$0xff]  ;;  %v516_v7 = vmul.f32 %v1302_v0, %v1302_v0  ;;  %497 = vmatpush.bf16.msra.mxu1 %v766_v2  ;;  %s760_s21 = sshll.u32 %s1170_s12, 3  ;;  %s410_s17 = scalar_lea.vmem [#allocation11], %s1280_s15 }
  0x52   : > { %506 = vadd.xlane.f32.xlu0 %v505_v3  ;;  %464 = vmatpush.bf16.msra.mxu0 %v764_v1  ;;  %v731_v6 = vmul.f32 -1.442695, %v412_v4  ;;  %v765_v8 = vld [vmem:[#allocation8] sm:$0xff]  ;;  %v768_v36 = vld [vmem:[#allocation10 + $0x8] sm:$0xff]  ;;  %v767_v39 = vld [vmem:[#allocation10] sm:$0xff]  ;;  %s588_s9 = scalar_lea.hbm %s1364_s8, %s760_s21  ;;  %s590_s2 = sshll.u32 %s410_s17, 4  ;;  %s591_s2 = int_to_ptr.vmem [resolvable:$true] %s590_s2 }
  0x53   : > { %v517_v9 = vsel %vm454_vm0, %v516_v7, 0.0  ;;  %569 = vmatpush.bf16.msra.mxu2 %v768_v36  ;;  %v854_v47 = vld [vmem:[%s1361_s5] ss:$0 sm:$0xff]  ;;  %s592_s29 = sshll.u32 %s588_s9, 4  ;;  %s578_s23 = scalar_lea.sflag [#allocation4], %s1277_s4  ;;  %s593_s29 = int_to_ptr.hbm [resolvable:$true] %s592_s29 }
  0x54   : > { %857 = vpow2.f32 %v731_v6  ;;  %v855_v48 = vld [vmem:[%s1362_s6] ss:$0 sm:$0xff]  ;;  %s1029_s10 = sshra.s32 %s593_s29, 4  ;;  %s1035_s16 = scalar_lea.hbm %s1364_s8, 16  ;;  %s1030_s10 = int_to_ptr.hbm [resolvable:$true] %s1029_s10 }
  0x55   : > { %498 = vmatpush.bf16.msra.mxu1 %v765_v8  ;;  %v856_v61 = vld [vmem:[%s1363_s7] ss:$0 sm:$0xff]  ;;  %s1031_s12 = scalar_lea.hbm %s1030_s10, 8  ;;  %p1036_p7 = scmp.lt.s32.totalorder %s1030_s10, %s1364_s8 }
  0x56   : > { %465 = vmatpush.bf16.msra.mxu0 %v763_v5  ;;  %p1032_p1 = scmp.ne.s32.totalorder %s1030_s10, %s1031_s12  ;;  %p1037_p9 = scmp.lt.s32.totalorder %s1035_s16, %s1031_s12 }
  0x57   : > { %570 = vmatpush.bf16.msra.mxu2 %v767_v39 }
  0x58   : > { %p1033_p3 = pnand %p1032_p1, %p1226_p0  ;;  %p1038_p8 = por %p1037_p9, %p1036_p7 }
  0x5a   : > { %v858_v10 = vpop.eup %857  ;;  %518 = vadd.xlane.f32.xlu0 %v517_v9  ;;  %p1034_p13 = pneg %p1033_p3 }
  0x5b   : > { %v416_v11 = vadd.f32 1.0, %v858_v10 }
  0x5c   : > { %p1039_p10 = pnand %p1038_p8, %p1034_p13 }
  0x5d   : > { %859 = vrcp.f32 %v416_v11  ;;  %v428_v14 = vand.u32 2147483648, %v416_v11  ;;  %vm422_vm1 = vweird.f32 %v416_v11  ;;  %v426_v16 = vand.u32 2147483647, %v416_v11 }
  0x5e   : > { %861 = vrcp.f32 %v1100_v24 }
  0x5f   : > { %v429_v18 = vor.u32 1.1754944e-38, %v428_v14  ;;  %vm427_vm4 = vcmp.eq.f32.partialorder %v426_v16, 8.507059e+37 }
  0x63   : > { %v860_v12 = vpop.eup %859 }
  0x64   : > { %v418_v13 = vmul.f32 %v860_v12, %v416_v11  ;;  %vm423_vm2 = vweird.f32 %v860_v12  ;;  %v862_v25 = vpop.eup %861 }
  0x65   : > { %vm424_vm3 = vmor %vm422_vm1, %vm423_vm2  ;;  %v509_v26 = vmul.f32 32.0, %v862_v25  ;;  %vm513_vm5 = vweird.f32 %v862_v25 }
  0x66   : > { %v419_v15 = vsub.f32 1.0, %v418_v13 }
  0x67   : > { %v510_v27 = vsub.f32 1.0, %v509_v26 }
  0x68   : > { %v420_v17 = vmul.f32 %v860_v12, %v419_v15 }
  0x69   : > { %v511_v28 = vmul.f32 %v862_v25, %v510_v27 }
  0x6a   : > { %v421_v19 = vadd.f32 %v860_v12, %v420_v17 }
  0x6b   : > { %v512_v29 = vadd.f32 %v862_v25, %v511_v28 }
  0x6c   : > { %v425_v20 = vsel %vm424_vm3, %v860_v12, %v421_v19 }
  0x6d   : > { %v430_v21 = vsel %vm427_vm4, %v429_v18, %v425_v20  ;;  %v514_v30 = vsel %vm513_vm5, %v862_v25, %v512_v29 }
  0x6e   : > { %v432_v22 = vmul.f32 %v430_v21, %v412_v4 }
  0x70   : > { %v433_v23 = vpack.c.bf16 %v432_v22, %v432_v22 }
  0x72   : > { %740 = vmatmul.msk.bf16.vlgmr.msra.gmra.mxu0 %vm454_vm0, %v433_v23  ;;  %749 = vmatmul.msk.bf16.vlgmr.msra.gmra.mxu1 %vm454_vm0, %v433_v23 }
  0xc5   : > { %v507_v31 = vpop.xlane.xlu0 %506 }
  0xc6   : > { %v515_v32 = vmul.f32 %v514_v30, %v507_v31 }
  0xc8   : > { %v521_v33 = vmul.f32 %v515_v32, %v515_v32  ;;  %v524_v50 = vsub.f32 %v1302_v0, %v515_v32 }
  0xcd   : > { %v519_v34 = vpop.xlane.xlu0 %518 }
  0xce   : > { %v520_v35 = vmul.f32 %v519_v34, %v514_v30 }
  0xd0   : > { %v522_v37 = vsub.f32 %v520_v35, %v521_v33 }
  0xd2   : > { %v523_v38 = vmax.f32 %v522_v37, 0.0 }
  0xd4   : > { %v525_v40 = vadd.f32 1e-06, %v523_v38 }
  0xd6   : > { %863 = vrsqrt.f32 %v525_v40  ;;  %vm532_vm7 = vweird.f32 %v525_v40 }
  0xdc   : > { %v864_v41 = vpop.eup %863 }
  0xdd   : > { %v527_v42 = vmul.f32 %v864_v41, %v525_v40  ;;  %vm533_vm6 = vweird.f32 %v864_v41 }
  0xde   : > { %vm534_vm8 = vmor %vm532_vm7, %vm533_vm6 }
  0xdf   : > { %v528_v43 = vmul.f32 %v864_v41, %v527_v42 }
  0xe1   : > { %v529_v44 = vmul.f32 0.5, %v528_v43 }
  0xe3   : > { %v530_v45 = vsub.f32 1.5, %v529_v44 }
  0xe5   : > { %v531_v46 = vmul.f32 %v864_v41, %v530_v45 }
  0xe7   : > { %v535_v49 = vsel %vm534_vm8, %v864_v41, %v531_v46 }
  0xe8   : > { %v536_v55 = vmul.f32 %v535_v49, %v524_v50 }
  0xef   : > { %v467_v51 = vpop.f32.mrf.mxu0  ;;  %v500_v52 = vpop.f32.mrf.mxu1 }
  0xf0   : > { %v468_v53 = vadd.f32 %v854_v47, %v467_v51  ;;  %v501_v54 = vadd.f32 %v855_v48, %v500_v52 }
  0xf2   : > { %v537_v56 = vmul.f32 %v536_v55, %v501_v54 }
  0xf4   : > { %v538_v57 = vadd.f32 %v537_v56, %v468_v53 }
  0xf6   : > { %v539_v58 = vpack.c.bf16 %v538_v57, %v538_v57 }
  0xf7   : > { %v469_v59 = vpop.f32.mrf.mxu0  ;;  %v502_v60 = vpop.f32.mrf.mxu1 }
  0xf8   : > { %758 = vmatmul.msk.bf16.vlgmr.msra.gmra.mxu2 %vm454_vm0, %v539_v58 }
 0x17b   : > { %v572_v62 = vpop.f32.mrf.mxu2 }
 0x17c   : > { %v573_v63 = vadd.f32 %v856_v61, %v572_v62 }
 0x17e   : > { %576 = vst [vmem:[%s410_s17] sm:$0xff] %v573_v63 }
 0x17f   : > { %1042 = shalt.err (!%p1039_p10)
}
 0x180   : > { %785 = dma.vmem_to_hbm [thread:$0]  (%p1226_p0), %s591_s2, 128, %s593_s29, %s578_s23  }
 0x183   : > { %v574_v0 = vpop.f32.mrf.mxu2 }
 0x184 PF: > { %s1386_s4 = sld [smem:[#allocation18_spill]]  ;;  %s604_s11 = sand.u32 1, %s1081_s27  }
 0x185   : > { %s605_s14 = scalar_lea.sflag [#allocation4], %s604_s11 }
 0x18a   : > { %p1387_p12 = scmp.ge.s32.totalorder %s1386_s4, 2 }
 0x18c   : > { %p805_p5 = pnand %p1387_p12, %p1232_p6 }
 0x18e   : > { %p806_p11 = pneg %p805_p5 }
 0x190   : > { %1076 = dma.done.wait (%p806_p11), %s605_s14, 128  }
 0x191   : > { %1078 = vsyncadd (%p806_p11), %s605_s14, 4294967168  ;;  %s1388_s30 = sld [smem:[#allocation19_spill]]  ;;  %s1391_s27 = smov %s1085_s28 }
 0x192   : > { %s1389_s3 = sld [smem:[#allocation17_spill]] }
 0x193   : > { %s1390_s29 = sld [smem:[#allocation20_spill]] }
 0x197   : > { %p25_p2 = scmp.ge.s32.totalorder %s1388_s30, 4  }
 0x198   : > { %s1392_s28 = smov %s1389_s3 }
 0x199   :  { %27 = sbr.rel (!%p25_p2) target bundleno = 12 (0xc), region = 122 }
 0x19e   :  { %611 = vsyncpa [#allocation3], 1 }
 0x19f   :  { %613 = vsyncpa [#allocation3 + $0x1], 1 }
 0x1a0   :  { %614 = vsyncpa [#allocation6], 1 }
 0x1a1   :  { %616 = vsyncpa [#allocation6 + $0x1], 1 }
 0x1a2   :  { %617 = vsyncpa [#allocation9], 1 }
 0x1a3   :  { %618 = vsyncpa [#allocation4], 1 }
 0x1a4   :  { %620 = vsyncpa [#allocation4 + $0x1], 1 }

</bundles_post_ra>
